<compile_context>
chip_gen: v6e
topology: v6e:2x2x1
jax: 0.10.0
libtpu: 0.0.40
codegen_flags: <defaults>
</compile_context>

<pallas_src>
import jax
import jax.numpy as jnp
from jax.experimental import pallas as pl
from jax.experimental.pallas import tpu as pltpu

NOTES_IN = 768
PHYSI_IN = 76
LANE = 128
SUBLANE = 8


def _round_up(x, m):
    return ((x + m - 1) // m) * m


def _pad_to(x, shape):
    return jnp.pad(x, [(0, t - s) for s, t in zip(x.shape, shape)])


def _physinotes_kernel(notes_ref, physi_ref,
                       wn_ref, bn_ref,
                       wp_ref, bp_ref,
                       wcn_ref, wcp_ref, bc_ref,
                       out_ref):
    # Cast activations to bf16 on the VPU here (instead of a separate wrapper
    # pad/cast pass): the kernel is HBM-bound, so the cast is free.
    notes_bf = notes_ref[...].astype(jnp.bfloat16)
    physi_bf = physi_ref[...].astype(jnp.bfloat16)

    # notes branch: tanh(notes @ Wn + bn) -- bf16 MXU operands, f32 accumulate,
    # bias add + tanh in f32.
    hn = jnp.tanh(
        jnp.dot(notes_bf, wn_ref[...], preferred_element_type=jnp.float32)
        + bn_ref[...])
    # physi branch: tanh(physi @ Wp + bp); native K=76 (Mosaic pads the layout
    # internally, no explicit feature padding needed).
    hp = jnp.tanh(
        jnp.dot(physi_bf, wp_ref[...], preferred_element_type=jnp.float32)
        + bp_ref[...])

    # Fused concat + classifier:
    #   concat([hn, hp], -1) @ Wc == hn @ Wc[:Hn] + hp @ Wc[Hn:]
    # Splitting Wc removes the fusion VMEM scratch round-trip entirely.
    # Dropout(p=0.3) is identity at inference time.
    out = (
        jnp.dot(hn.astype(jnp.bfloat16), wcn_ref[...],
                preferred_element_type=jnp.float32)
        + jnp.dot(hp.astype(jnp.bfloat16), wcp_ref[...],
                  preferred_element_type=jnp.float32)
        + bc_ref[...])
    out_ref[...] = out.astype(out_ref.dtype)


def pack_params(params):
    """Pad / cast / split the logical params once, off the forward path."""
    wn, bn = params["notes_w"], params["notes_b"]      # (768, Hn), (1, Hn)
    wp, bp = params["physi_w"], params["physi_b"]      # (76,  Hp), (1, Hp)
    wc, bc = params["cls_w"], params["cls_b"]          # (Hn+Hp, C), (1, C)

    Hn, Hp = wn.shape[1], wp.shape[1]
    C = wc.shape[1]
    Hn_p, Hp_p = _round_up(Hn, LANE), _round_up(Hp, LANE)
    C_p = _round_up(C, LANE)

    return {
        "wn": _pad_to(wn, (NOTES_IN, Hn_p)).astype(jnp.bfloat16),
        "bn": _pad_to(bn, (1, Hn_p)).astype(jnp.float32),
        "wp": _pad_to(wp, (PHYSI_IN, Hp_p)).astype(jnp.bfloat16),
        "bp": _pad_to(bp, (1, Hp_p)).astype(jnp.float32),
        # Classifier weight split into the notes / physi row halves so the
        # kernel can fuse the concat as two matmuls (no fusion scratch).
        "wc_n": _pad_to(wc[:Hn, :], (Hn_p, C_p)).astype(jnp.bfloat16),
        "wc_p": _pad_to(wc[Hn:, :], (Hp_p, C_p)).astype(jnp.bfloat16),
        "bc": _pad_to(bc, (1, C_p)).astype(jnp.float32),
    }


def physinotes_forward(notes, physi, packed, n_classes):
    """notes: (B, 768) f32, physi: (B, 76) f32. Returns (B, n_classes) f32."""
    wn, bn = packed["wn"], packed["bn"]
    wp, bp = packed["wp"], packed["bp"]
    wcn, wcp, bc = packed["wc_n"], packed["wc_p"], packed["bc"]

    B = notes.shape[0]
    C_p = wcn.shape[1]

    # Batch tile: up to 1024 rows per grid step (per-step DMA dwarfs the
    # ~0.35 us step overhead), capped so the grid has >= 2 steps when B allows
    # (keeps both v7x TensorCores busy under the "parallel" batch axis).
    # No wrapper-side batch padding: Pallas masks the out-of-bounds rows of
    # the edge block, and rows are independent so they cannot contaminate
    # real outputs.  At TB=1024 the double-buffered f32 tiles total ~8 MB,
    # inside the default scoped VMEM on v5e/v6e/v7x.
    TB = min(1024, _round_up((B + 1) // 2, SUBLANE))
    grid = ((B + TB - 1) // TB,)

    act_spec = lambda feat: pl.BlockSpec((TB, feat), lambda i: (i, 0))
    # Constant index_map -> weights/biases DMA'd once, VMEM-resident.
    res_spec = lambda shape: pl.BlockSpec(shape, lambda i: (0, 0))

    out = pl.pallas_call(
        _physinotes_kernel,
        out_shape=jax.ShapeDtypeStruct((B, C_p), jnp.float32),
        grid=grid,
        in_specs=[
            act_spec(NOTES_IN),            # notes tile (f32, cast in kernel)
            act_spec(PHYSI_IN),            # physi tile (f32, cast in kernel)
            res_spec(wn.shape), res_spec(bn.shape),
            res_spec(wp.shape), res_spec(bp.shape),
            res_spec(wcn.shape), res_spec(wcp.shape), res_spec(bc.shape),
        ],
        out_specs=pl.BlockSpec((TB, C_p), lambda i: (i, 0)),
        compiler_params=pltpu.CompilerParams(
            dimension_semantics=("parallel",)),
    )(notes, physi, wn, bn, wp, bp, wcn, wcp, bc)

    # Only the lane padding is sliced off; logits stay f32 like the reference.
    return out[:, :n_classes]


def init_params(key, notes_hidden, physi_hidden, n_classes):
    k = jax.random.split(key, 6)
    total_hidden = notes_hidden + physi_hidden
    scale = 0.02
    return {
        # stored already transposed: (in_features, out_features)
        "notes_w": scale * jax.random.normal(k[0], (NOTES_IN, notes_hidden), jnp.float32),
        "notes_b": scale * jax.random.normal(k[1], (1, notes_hidden), jnp.float32),
        "physi_w": scale * jax.random.normal(k[2], (PHYSI_IN, physi_hidden), jnp.float32),
        "physi_b": scale * jax.random.normal(k[3], (1, physi_hidden), jnp.float32),
        "cls_w":   scale * jax.random.normal(k[4], (total_hidden, n_classes), jnp.float32),
        "cls_b":   scale * jax.random.normal(k[5], (1, n_classes), jnp.float32),
    }


def reference_forward(notes, physi, params):
    hn = jnp.tanh(notes @ params["notes_w"] + params["notes_b"])
    hp = jnp.tanh(physi @ params["physi_w"] + params["physi_b"])
    fusion = jnp.concatenate([hn, hp], axis=-1)
    return fusion @ params["cls_w"] + params["cls_b"]


if __name__ == "__main__":
    key = jax.random.PRNGKey(0)
    k_in, k_p = jax.random.split(key)
    kn, kp = jax.random.split(k_in)

    B = 8
    notes_hidden, physi_hidden, n_classes = 32, 32, 8

    notes = jax.random.normal(kn, (B, NOTES_IN), jnp.float32)
    physi = jax.random.normal(kp, (B, PHYSI_IN), jnp.float32)
    params = init_params(k_p, notes_hidden, physi_hidden, n_classes)
    packed = pack_params(params)

    out = physinotes_forward(notes, physi, packed, n_classes)
    out = jax.block_until_ready(out)

    ref = reference_forward(notes, physi, params)
    assert out.shape == (B, n_classes)
    # bf16 MXU operands vs f32 reference -> loose tolerance.
    assert jnp.allclose(out, ref, atol=2e-2, rtol=2e-2), "mismatch vs reference"

    print("KERNEL_OK")
</pallas_src>

<mosaic_0001>
module attributes {stable_mosaic.version = 11 : i64} {
  func.func @_physinotes_kernel(%arg0: i32, %arg1: memref<8x768xf32, #tpu.memory_space<vmem>>, %arg2: memref<8x76xf32, #tpu.memory_space<vmem>>, %arg3: memref<768x128xbf16, #tpu.memory_space<vmem>>, %arg4: memref<1x128xf32, #tpu.memory_space<vmem>>, %arg5: memref<76x128xbf16, #tpu.memory_space<vmem>>, %arg6: memref<1x128xf32, #tpu.memory_space<vmem>>, %arg7: memref<128x128xbf16, #tpu.memory_space<vmem>>, %arg8: memref<128x128xbf16, #tpu.memory_space<vmem>>, %arg9: memref<1x128xf32, #tpu.memory_space<vmem>>, %arg10: memref<8x128xf32, #tpu.memory_space<vmem>>) attributes {dimension_semantics = [#tpu.dimension_semantics<parallel>], iteration_bounds = array<i64: 1>, scalar_prefetch = 0 : i64, scratch_operands = 0 : i64, tpu.core_type = #tpu.core_type<tc>, window_params = [{transform_indices = @transform_0, window_bounds = array<i64: 8, 768>}, {transform_indices = @transform_1, window_bounds = array<i64: 8, 76>}, {pipeline_mode = #tpu.pipeline_mode<synchronous>, transform_indices = @transform_2, window_bounds = array<i64: 768, 128>}, {pipeline_mode = #tpu.pipeline_mode<synchronous>, transform_indices = @transform_3, window_bounds = array<i64: 1, 128>}, {pipeline_mode = #tpu.pipeline_mode<synchronous>, transform_indices = @transform_4, window_bounds = array<i64: 76, 128>}, {pipeline_mode = #tpu.pipeline_mode<synchronous>, transform_indices = @transform_5, window_bounds = array<i64: 1, 128>}, {pipeline_mode = #tpu.pipeline_mode<synchronous>, transform_indices = @transform_6, window_bounds = array<i64: 128, 128>}, {pipeline_mode = #tpu.pipeline_mode<synchronous>, transform_indices = @transform_7, window_bounds = array<i64: 128, 128>}, {pipeline_mode = #tpu.pipeline_mode<synchronous>, transform_indices = @transform_8, window_bounds = array<i64: 1, 128>}, {transform_indices = @transform_9, window_bounds = array<i64: 8, 128>}]} {
    %c0 = arith.constant 0 : index
    %c0_0 = arith.constant 0 : index
    %0 = vector.load %arg1[%c0, %c0_0] : memref<8x768xf32, #tpu.memory_space<vmem>>, vector<8x768xf32>
    %1 = arith.truncf %0 : vector<8x768xf32> to vector<8x768xbf16>
    %c0_1 = arith.constant 0 : index
    %c0_2 = arith.constant 0 : index
    %2 = vector.load %arg2[%c0_1, %c0_2] : memref<8x76xf32, #tpu.memory_space<vmem>>, vector<8x76xf32>
    %3 = arith.truncf %2 : vector<8x76xf32> to vector<8x76xbf16>
    %c0_3 = arith.constant 0 : index
    %c0_4 = arith.constant 0 : index
    %4 = vector.load %arg3[%c0_3, %c0_4] : memref<768x128xbf16, #tpu.memory_space<vmem>>, vector<768x128xbf16>
    %cst = arith.constant dense<0.000000e+00> : vector<8x128xf32>
    %5 = tpu.matmul %1, %4, %cst {dimension_numbers = #tpu.dot_dimension_numbers<[1], [0], [0], [1], [0, 0, 1, 1], [], []>} : vector<8x768xbf16>, vector<768x128xbf16>, vector<8x128xf32> -> vector<8x128xf32>
    %c0_5 = arith.constant 0 : index
    %c0_6 = arith.constant 0 : index
    %6 = vector.load %arg4[%c0_5, %c0_6] : memref<1x128xf32, #tpu.memory_space<vmem>>, vector<1x128xf32>
    %7 = vector.broadcast %6 : vector<1x128xf32> to vector<8x128xf32>
    %8 = arith.addf %5, %7 : vector<8x128xf32>
    %9 = math.tanh %8 : vector<8x128xf32>
    %c0_7 = arith.constant 0 : index
    %c0_8 = arith.constant 0 : index
    %10 = vector.load %arg5[%c0_7, %c0_8] : memref<76x128xbf16, #tpu.memory_space<vmem>>, vector<76x128xbf16>
    %cst_9 = arith.constant dense<0.000000e+00> : vector<8x128xf32>
    %11 = tpu.matmul %3, %10, %cst_9 {dimension_numbers = #tpu.dot_dimension_numbers<[1], [0], [0], [1], [0, 0, 1, 1], [], []>} : vector<8x76xbf16>, vector<76x128xbf16>, vector<8x128xf32> -> vector<8x128xf32>
    %c0_10 = arith.constant 0 : index
    %c0_11 = arith.constant 0 : index
    %12 = vector.load %arg6[%c0_10, %c0_11] : memref<1x128xf32, #tpu.memory_space<vmem>>, vector<1x128xf32>
    %13 = vector.broadcast %12 : vector<1x128xf32> to vector<8x128xf32>
    %14 = arith.addf %11, %13 : vector<8x128xf32>
    %15 = math.tanh %14 : vector<8x128xf32>
    %16 = arith.truncf %9 : vector<8x128xf32> to vector<8x128xbf16>
    %c0_12 = arith.constant 0 : index
    %c0_13 = arith.constant 0 : index
    %17 = vector.load %arg7[%c0_12, %c0_13] : memref<128x128xbf16, #tpu.memory_space<vmem>>, vector<128x128xbf16>
    %cst_14 = arith.constant dense<0.000000e+00> : vector<8x128xf32>
    %18 = tpu.matmul %16, %17, %cst_14 {dimension_numbers = #tpu.dot_dimension_numbers<[1], [0], [0], [1], [0, 0, 1, 1], [], []>} : vector<8x128xbf16>, vector<128x128xbf16>, vector<8x128xf32> -> vector<8x128xf32>
    %19 = arith.truncf %15 : vector<8x128xf32> to vector<8x128xbf16>
    %c0_15 = arith.constant 0 : index
    %c0_16 = arith.constant 0 : index
    %20 = vector.load %arg8[%c0_15, %c0_16] : memref<128x128xbf16, #tpu.memory_space<vmem>>, vector<128x128xbf16>
    %cst_17 = arith.constant dense<0.000000e+00> : vector<8x128xf32>
    %21 = tpu.matmul %19, %20, %cst_17 {dimension_numbers = #tpu.dot_dimension_numbers<[1], [0], [0], [1], [0, 0, 1, 1], [], []>} : vector<8x128xbf16>, vector<128x128xbf16>, vector<8x128xf32> -> vector<8x128xf32>
    %22 = arith.addf %18, %21 : vector<8x128xf32>
    %c0_18 = arith.constant 0 : index
    %c0_19 = arith.constant 0 : index
    %23 = vector.load %arg9[%c0_18, %c0_19] : memref<1x128xf32, #tpu.memory_space<vmem>>, vector<1x128xf32>
    %24 = vector.broadcast %23 : vector<1x128xf32> to vector<8x128xf32>
    %25 = arith.addf %22, %24 : vector<8x128xf32>
    %c0_20 = arith.constant 0 : index
    %c0_21 = arith.constant 0 : index
    %26 = vector.load %arg10[%c0_20, %c0_21] : memref<8x128xf32, #tpu.memory_space<vmem>>, vector<8x128xf32>
    tpu.vector_store %arg10[%c0_20, %c0_21], %25 {strides = array<i32>} : memref<8x128xf32, #tpu.memory_space<vmem>>, vector<8x128xf32>,
    return
  }
  func.func @transform_0(%arg0: i32) -> (i32, i32) {
    %c0_i32 = arith.constant 0 : i32
    %c0_i32_0 = arith.constant 0 : i32
    return %arg0, %c0_i32 : i32, i32
  }
  func.func @transform_1(%arg0: i32) -> (i32, i32) {
    %c0_i32 = arith.constant 0 : i32
    %c0_i32_0 = arith.constant 0 : i32
    return %arg0, %c0_i32 : i32, i32
  }
  func.func @transform_2(%arg0: i32) -> (i32, i32) {
    %c0_i32 = arith.constant 0 : i32
    %c0_i32_0 = arith.constant 0 : i32
    %c0_i32_1 = arith.constant 0 : i32
    return %c0_i32, %c0_i32_0 : i32, i32
  }
  func.func @transform_3(%arg0: i32) -> (i32, i32) {
    %c0_i32 = arith.constant 0 : i32
    %c0_i32_0 = arith.constant 0 : i32
    %c0_i32_1 = arith.constant 0 : i32
    return %c0_i32, %c0_i32_0 : i32, i32
  }
  func.func @transform_4(%arg0: i32) -> (i32, i32) {
    %c0_i32 = arith.constant 0 : i32
    %c0_i32_0 = arith.constant 0 : i32
    %c0_i32_1 = arith.constant 0 : i32
    return %c0_i32, %c0_i32_0 : i32, i32
  }
  func.func @transform_5(%arg0: i32) -> (i32, i32) {
    %c0_i32 = arith.constant 0 : i32
    %c0_i32_0 = arith.constant 0 : i32
    %c0_i32_1 = arith.constant 0 : i32
    return %c0_i32, %c0_i32_0 : i32, i32
  }
  func.func @transform_6(%arg0: i32) -> (i32, i32) {
    %c0_i32 = arith.constant 0 : i32
    %c0_i32_0 = arith.constant 0 : i32
    %c0_i32_1 = arith.constant 0 : i32
    return %c0_i32, %c0_i32_0 : i32, i32
  }
  func.func @transform_7(%arg0: i32) -> (i32, i32) {
    %c0_i32 = arith.constant 0 : i32
    %c0_i32_0 = arith.constant 0 : i32
    %c0_i32_1 = arith.constant 0 : i32
    return %c0_i32, %c0_i32_0 : i32, i32
  }
  func.func @transform_8(%arg0: i32) -> (i32, i32) {
    %c0_i32 = arith.constant 0 : i32
    %c0_i32_0 = arith.constant 0 : i32
    %c0_i32_1 = arith.constant 0 : i32
    return %c0_i32, %c0_i32_0 : i32, i32
  }
  func.func @transform_9(%arg0: i32) -> (i32, i32) {
    %c0_i32 = arith.constant 0 : i32
    %c0_i32_0 = arith.constant 0 : i32
    return %arg0, %c0_i32 : i32, i32
  }
}

</mosaic_0001>

<bundles_post_ra>
// kernel: tpu_custom_call.1
= control target key start
LH: loop header
LB: loop body
LE: loop exit
PB: predicated region body
PF: predicated region fallthrough
CT: control target
= control target key end

     0   :  { %14 = vsyncpa [#allocation3], 0  ;;  %s1551_s0 = inlined_call_operand.hbm [shape: f32[8,768], index: 0, kind: input, shape index: {}]   ;;  %s1552_s1 = inlined_call_operand.hbm [shape: f32[8,76], index: 1, kind: input, shape index: {}]   ;;  %s1553_s2 = inlined_call_operand.hbm [shape: bf16[768,128], index: 2, kind: input, shape index: {}]   ;;  %s1554_s3 = inlined_call_operand.vmem [shape: f32[1,128], index: 3, kind: input, shape index: {}]   ;;  %s1555_s4 = inlined_call_operand.hbm [shape: bf16[76,128], index: 4, kind: input, shape index: {}]   ;;  %s1556_s5 = inlined_call_operand.vmem [shape: f32[1,128], index: 5, kind: input, shape index: {}]   ;;  %s1557_s6 = inlined_call_operand.hbm [shape: bf16[128,128], index: 6, kind: input, shape index: {}]   ;;  %s1558_s7 = inlined_call_operand.hbm [shape: bf16[128,128], index: 7, kind: input, shape index: {}]   ;;  %s1559_s8 = inlined_call_operand.vmem [shape: f32[1,128], index: 8, kind: input, shape index: {}]   ;;  %s1560_s9 = inlined_call_operand.hbm [shape: f32[8,128], index: 9, kind: output, shape index: {}]  }
   0x1   :  { %15 = vsyncpa [#allocation6], 0 }
   0x2   :  { %16 = vsyncpa [#allocation9], 0 }
   0x3   :  { %17 = vsyncpa [#allocation12], 0 }
   0x4   :  { %18 = vsyncpa [#allocation4], 0  ;;  %s1421_s30 = smov [#allocation5]  }
   0x5   :  { %s35_s10 = sshll.u32 %s1421_s30, 4  ;;  %s36_s10 = int_to_ptr.vmem [resolvable:$true] %s35_s10 }
   0x6   :  { %s1279_s11 = scalar_lea.vmem %s36_s10, 128  ;;  %p1284_p1 = scmp.lt.s32.totalorder %s36_s10, %s36_s10 }
   0x7   :  { %p1280_p0 = scmp.ne.s32.totalorder %s36_s10, %s1279_s11  ;;  %p1285_p2 = scmp.lt.s32.totalorder %s1279_s11, %s1279_s11 }
   0x9   :  { %p1286_p3 = por %p1285_p2, %p1284_p1 }
   0xb   :  { %p1287_p4 = pnand %p1286_p3, %p1280_p0 }
   0xd   :  { %1290 = shalt.err (!%p1287_p4)
}
   0xe   :  { %38 = dma.hbm_to_vmem [thread:$0]  %s1552_s1, 128, %s36_s10, [#allocation6]  }
   0xf   :  { %s1422_s14 = smov [#allocation8]   ;;  %s1423_s16 = smov [#allocation2]  }
  0x10   :  { %s58_s15 = sshll.u32 %s1422_s14, 4  ;;  %s25_s17 = sshll.u32 %s1423_s16, 4  ;;  %s59_s15 = int_to_ptr.vmem [resolvable:$true] %s58_s15  ;;  %s26_s17 = int_to_ptr.vmem [resolvable:$true] %s25_s17 }
  0x11   :  { %s1299_s18 = scalar_lea.vmem %s59_s15, 640  ;;  %p1304_p6 = scmp.lt.s32.totalorder %s59_s15, %s59_s15 }
  0x12   :  { %p1300_p5 = scmp.ne.s32.totalorder %s59_s15, %s1299_s18  ;;  %p1305_p7 = scmp.lt.s32.totalorder %s1299_s18, %s1299_s18 }
  0x14   :  { %p1306_p8 = por %p1305_p7, %p1304_p6 }
  0x16   :  { %p1307_p9 = pnand %p1306_p8, %p1300_p5 }
  0x18   :  { %1310 = shalt.err (!%p1307_p9)
}
  0x19   :  { %s1424_s19 = smov 64   ;;  %s1425_s20 = smov 4  }
  0x1a   :  { %64 = dma.hbm_to_vmem [thread:$0]  %s1555_s4, 640, %s59_s15, [#allocation9], %s1424_s19, %s1424_s19, %s1425_s20  }
  0x1b   :  { %s1319_s1 = scalar_lea.vmem %s26_s17, 768  ;;  %p1324_p11 = scmp.lt.s32.totalorder %s26_s17, %s26_s17 }
  0x1c   :  { %p1320_p10 = scmp.ne.s32.totalorder %s26_s17, %s1319_s1  ;;  %p1325_p12 = scmp.lt.s32.totalorder %s1319_s1, %s1319_s1 }
  0x1e   :  { %p1326_p13 = por %p1325_p12, %p1324_p11 }
  0x20   :  { %p1327_p0 = pnand %p1326_p13, %p1320_p10 }
  0x22   :  { %1330 = shalt.err (!%p1327_p0)
}
  0x23   :  { %28 = dma.hbm_to_vmem [thread:$0]  %s1551_s0, 768, %s26_s17, [#allocation3]  }
  0x24   :  { %s1426_s25 = smov [#allocation7]   ;;  %s1427_s27 = smov [#allocation10]  }
  0x25   :  { %s44_s26 = sshll.u32 %s1426_s25, 4  ;;  %s72_s28 = sshll.u32 %s1427_s27, 4  ;;  %s45_s26 = int_to_ptr.vmem [resolvable:$true] %s44_s26  ;;  %s73_s28 = int_to_ptr.vmem [resolvable:$true] %s72_s28 }
  0x26   :  { %s1339_s29 = scalar_lea.vmem %s45_s26, 6144  ;;  %p1344_p2 = scmp.lt.s32.totalorder %s45_s26, %s45_s26 }
  0x27   :  { %p1340_p1 = scmp.ne.s32.totalorder %s45_s26, %s1339_s29  ;;  %p1345_p3 = scmp.lt.s32.totalorder %s1339_s29, %s1339_s29 }
  0x29   :  { %p1346_p4 = por %p1345_p3, %p1344_p2 }
  0x2b   :  { %p1347_p5 = pnand %p1346_p4, %p1340_p1 }
  0x2d   :  { %1350 = shalt.err (!%p1347_p5)
}
  0x2e   :  { %50 = dma.hbm_to_vmem [thread:$0]  %s1553_s2, 6144, %s45_s26, [#allocation6], %s1424_s19, %s1424_s19, %s1425_s20  }
  0x2f   :  { %s1359_s0 = scalar_lea.vmem %s73_s28, 1024  ;;  %p1364_p7 = scmp.lt.s32.totalorder %s73_s28, %s73_s28 }
  0x30   :  { %p1360_p6 = scmp.ne.s32.totalorder %s73_s28, %s1359_s0  ;;  %p1365_p8 = scmp.lt.s32.totalorder %s1359_s0, %s1359_s0 }
  0x32   :  { %p1366_p9 = por %p1365_p8, %p1364_p7 }
  0x34   :  { %p1367_p10 = pnand %p1366_p9, %p1360_p6 }
  0x36   :  { %1370 = shalt.err (!%p1367_p10)
}
  0x37   :  { %78 = dma.hbm_to_vmem [thread:$0]  %s1557_s6, 1024, %s73_s28, [#allocation9], %s1424_s19, %s1424_s19, %s1425_s20  }
  0x38   :  { %s1428_s12 = smov [#allocation11]  }
  0x39   :  { %s84_s13 = sshll.u32 %s1428_s12, 4  ;;  %s85_s13 = int_to_ptr.vmem [resolvable:$true] %s84_s13 }
  0x3a   :  { %s1379_s14 = scalar_lea.vmem %s85_s13, 1024  ;;  %p1384_p12 = scmp.lt.s32.totalorder %s85_s13, %s85_s13 }
  0x3b   :  { %p1380_p11 = scmp.ne.s32.totalorder %s85_s13, %s1379_s14  ;;  %p1385_p13 = scmp.lt.s32.totalorder %s1379_s14, %s1379_s14 }
  0x3d   :  { %p1386_p0 = por %p1385_p13, %p1384_p12 }
  0x3f   :  { %p1387_p1 = pnand %p1386_p0, %p1380_p11 }
  0x41   :  { %1390 = shalt.err (!%p1387_p1)
}
  0x42   :  { %90 = dma.hbm_to_vmem [thread:$0]  %s1558_s7, 1024, %s85_s13, [#allocation12], %s1424_s19, %s1424_s19, %s1425_s20  }
  0x43   :  { %1411 = dma.done.wait [#allocation3], 768  }
  0x44   :  { %1412 = vsyncadd [#allocation3], 4294966528 }
  0x45   :  { %1413 = dma.done.wait [#allocation6], 6272  }
  0x46   :  { %1414 = vsyncadd [#allocation6], 4294961024 }
  0x47   :  { %1415 = dma.done.wait [#allocation9], 1664  }
  0x48   :  { %1416 = vsyncadd [#allocation9], 4294965632 }
  0x49   :  { %1417 = dma.done.wait [#allocation12], 1024  }
  0x4a   :  { %1418 = vsyncadd [#allocation12], 4294966272  ;;  %v1198_v0 = vld [vmem:[#allocation7 + $0x78] sm:$0xff]   ;;  %v1202_v4 = vld [vmem:[#allocation7 + $0x70] sm:$0xff]   ;;  %v1429_v44 = vmov 0.0   ;;  %vm688_vm0 = vcmask 1045504  }
  0x4b   :  { %v1199_v1 = vld [vmem:[#allocation7 + $0x38] sm:$0xff]   ;;  %1043 = vmatprep.subr.bf16.mxu0 %v1198_v0  ;;  %v1203_v5 = vld [vmem:[#allocation7 + $0x30] sm:$0xff]   ;;  %v1206_v8 = vld [vmem:[#allocation7 + $0x68] sm:$0xff]   ;;  %vm1430_vm1 = vmmov 0   ;;  %vm684_vm2 = vcmask 621568   ;;  %s1431_s18 = smov [#allocation13]  }
  0x4c   :  { %v1200_v2 = vld [vmem:[#allocation7 + $0xf8] sm:$0xff]   ;;  %1044 = vmatpush3.bf16.msra.mxu0 %v1199_v1  ;;  %v1204_v6 = vld [vmem:[#allocation7 + $0xf0] sm:$0xff]   ;;  %v1207_v9 = vld [vmem:[#allocation7 + $0x28] sm:$0xff]   ;;  %s958_s19 = sshll.u32 %s1431_s18, 4  ;;  %s959_s19 = int_to_ptr.vmem [resolvable:$true] %s958_s19 }
  0x4d   :  { %v1201_v3 = vld [vmem:[#allocation7 + $0xb8] sm:$0xff]   ;;  %1065 = vmatprep.subr.bf16.mxu1 %v1200_v2  ;;  %1045 = vmatprep.subr.bf16.mxu0 %v1202_v4  ;;  %v1205_v7 = vld [vmem:[#allocation7 + $0xb0] sm:$0xff]   ;;  %v1208_v10 = vld [vmem:[#allocation7 + $0xe8] sm:$0xff]   ;;  %s1391_s20 = scalar_lea.vmem %s959_s19, 128  ;;  %p1396_p3 = scmp.lt.s32.totalorder %s959_s19, %s959_s19 }
  0x4e   :  { %1066 = vmatpush3.bf16.msra.mxu1 %v1201_v3  ;;  %v1209_v11 = vld [vmem:[#allocation7 + $0xa8] sm:$0xff]   ;;  %v1210_v12 = vld [vmem:[#allocation7 + $0x60] sm:$0xff]   ;;  %v1214_v16 = vld [vmem:[#allocation7 + $0x58] sm:$0xff]   ;;  %p1392_p2 = scmp.ne.s32.totalorder %s959_s19, %s1391_s20  ;;  %p1397_p4 = scmp.lt.s32.totalorder %s1391_s20, %s1391_s20 }
  0x4f   :  { %1067 = vmatprep.subr.bf16.mxu1 %v1204_v6  ;;  %v1211_v13 = vld [vmem:[#allocation7 + $0x20] sm:$0xff]   ;;  %v1215_v17 = vld [vmem:[#allocation7 + $0x18] sm:$0xff]   ;;  %v1218_v20 = vld [vmem:[#allocation7 + $0x50] sm:$0xff]  }
  0x50   :  { %1046 = vmatpush3.bf16.msra.mxu0 %v1203_v5  ;;  %v1212_v14 = vld [vmem:[#allocation7 + $0xe0] sm:$0xff]   ;;  %v1216_v18 = vld [vmem:[#allocation7 + $0xd8] sm:$0xff]   ;;  %v1219_v21 = vld [vmem:[#allocation7 + $0x10] sm:$0xff]   ;;  %p1398_p5 = por %p1397_p4, %p1396_p3 }
  0x51   :  { %1047 = vmatprep.subr.bf16.mxu0 %v1206_v8  ;;  %v1213_v15 = vld [vmem:[#allocation7 + $0xa0] sm:$0xff]   ;;  %v1217_v19 = vld [vmem:[#allocation7 + $0x98] sm:$0xff]   ;;  %v1220_v22 = vld [vmem:[#allocation7 + $0xd0] sm:$0xff]  }
  0x52   :  { %1068 = vmatpush3.bf16.msra.mxu1 %v1205_v7  ;;  %v1221_v23 = vld [vmem:[#allocation7 + $0x90] sm:$0xff]   ;;  %v1222_v24 = vld [vmem:[#allocation7 + $0x48] sm:$0xff]   ;;  %v1226_v28 = vld [vmem:[#allocation7 + $0x40] sm:$0xff]   ;;  %p1399_p6 = pnand %p1398_p5, %p1392_p2 }
  0x53   :  { %1069 = vmatprep.subr.bf16.mxu1 %v1208_v10  ;;  %v1223_v25 = vld [vmem:[#allocation7 + $0x8] sm:$0xff]   ;;  %v1227_v29 = vld [vmem:[#allocation7] sm:$0xff]   ;;  %v113_v31 = vld [vmem:[#allocation2 + $0x8] sm:$0xff] }
  0x54   :  { %1048 = vmatpush3.bf16.msra.mxu0 %v1207_v9  ;;  %v1224_v26 = vld [vmem:[#allocation7 + $0xc8] sm:$0xff]   ;;  %v1228_v30 = vld [vmem:[#allocation7 + $0xc0] sm:$0xff]   ;;  %v119_v32 = vpack.c.bf16 %v113_v31, %v113_v31  ;;  %v1230_v36 = vld [vmem:[#allocation7 + $0x178] sm:$0xff]  }
  0x55   :  { %1049 = vmatprep.subr.bf16.mxu0 %v1210_v12  ;;  %v1225_v27 = vld [vmem:[#allocation7 + $0x88] sm:$0xff]   ;;  %v1229_v33 = vld [vmem:[#allocation7 + $0x80] sm:$0xff]   ;;  %v1231_v39 = vld [vmem:[#allocation7 + $0x138] sm:$0xff]  }
  0x56   :  { %1070 = vmatpush3.bf16.msra.mxu1 %v1209_v11  ;;  %v112_v34 = vld [vmem:[#allocation2] sm:$0xff]  ;;  %v115_v37 = vld [vmem:[#allocation2 + $0x18] sm:$0xff]  ;;  %549 = vmatprep.mubr.bf16.mxu0 %v119_v32  ;;  %v114_v40 = vld [vmem:[#allocation2 + $0x10] sm:$0xff] }
  0x57   :  { %1071 = vmatprep.subr.bf16.mxu1 %v1212_v14  ;;  %v118_v35 = vpack.c.bf16 %v112_v34, %v112_v34  ;;  %v121_v38 = vpack.c.bf16 %v115_v37, %v115_v37  ;;  %v120_v41 = vpack.c.bf16 %v114_v40, %v114_v40  ;;  %v1232_v42 = vld [vmem:[#allocation7 + $0x170] sm:$0xff]   ;;  %v1234_v45 = vld [vmem:[#allocation7 + $0x168] sm:$0xff]   ;;  %v1236_v47 = vld [vmem:[#allocation8 + $0x20] sm:$0x3f]  }
  0x58   :  { %1050 = vmatpush3.bf16.msra.mxu0 %v1211_v13  ;;  %v1233_v43 = vld [vmem:[#allocation7 + $0x130] sm:$0xff]   ;;  %v1235_v46 = vld [vmem:[#allocation7 + $0x128] sm:$0xff]   ;;  %v1237_v48 = vld [vmem:[#allocation7 + $0x160] sm:$0xff]   ;;  %v690_v49 = vsel %vm688_vm0, %v1236_v47, 0 }
  0x59   :  { %1051 = vmatprep.subr.bf16.mxu0 %v1214_v16  ;;  %589 = vmatprep.mubr.bf16.mxu1 %v121_v38  ;;  %v1239_v50 = vld [vmem:[#allocation8 + $0x18] sm:$0xff]   ;;  %v1238_v51 = vld [vmem:[#allocation7 + $0x120] sm:$0xff]   ;;  %v1242_v53 = vld [vmem:[#allocation8 + $0x10] sm:$0xff]  }
  0x5a   :  { %1072 = vmatpush3.bf16.msra.mxu1 %v1213_v15  ;;  %v1240_v52 = vld [vmem:[#allocation7 + $0x158] sm:$0xff]   ;;  %v1243_v55 = vld [vmem:[#allocation7 + $0x150] sm:$0xff]   ;;  %v1245_v56 = vld [vmem:[#allocation8 + $0x8] sm:$0xff]  }
  0x5b   :  { %1073 = vmatprep.subr.bf16.mxu1 %v1216_v18  ;;  %v1241_v54 = vld [vmem:[#allocation7 + $0x118] sm:$0xff]   ;;  %v1244_v57 = vld [vmem:[#allocation7 + $0x110] sm:$0xff]   ;;  %v1246_v58 = vld [vmem:[#allocation7 + $0x148] sm:$0xff]  }
  0x5c   :  { %1052 = vmatpush3.bf16.msra.mxu0 %v1215_v17  ;;  %v1247_v59 = vld [vmem:[#allocation7 + $0x108] sm:$0xff]   ;;  %v1248_v60 = vld [vmem:[#allocation8] sm:$0xff]   ;;  %v117_v61 = vld [vmem:[#allocation2 + $0x28] sm:$0xff] }
  0x5d   :  { %1053 = vmatprep.subr.bf16.mxu0 %v1218_v20  ;;  %v1249_v62 = vld [vmem:[#allocation7 + $0x140] sm:$0xff]   ;;  %v124_v63 = vld [vmem:[#allocation5] sm:$0xff]  ;;  %v123_v0 = vpack.c.bf16 %v117_v61, %v117_v61  ;;  %v116_v3 = vld [vmem:[#allocation2 + $0x20] sm:$0xff] }
  0x5e   :  { %1074 = vmatpush3.bf16.msra.mxu1 %v1217_v19  ;;  %v1250_v1 = vld [vmem:[#allocation7 + $0x100] sm:$0xff]   ;;  %v125_v2 = vpack.c.bf16 %v124_v63, %v124_v63  ;;  %v122_v4 = vpack.c.bf16 %v116_v3, %v116_v3  ;;  %v1252_v7 = vld [vmem:[#allocation11 + $0x30] sm:$0xff]   ;;  %v1254_v9 = vld [vmem:[#allocation11 + $0x28] sm:$0xff]  }
  0x5f   :  { %1075 = vmatprep.subr.bf16.mxu1 %v1220_v22  ;;  %v1251_v5 = vld [vmem:[#allocation11 + $0x38] sm:$0xff]   ;;  %v1255_v8 = vld [vmem:[#allocation10 + $0x30] sm:$0xff]   ;;  %v1256_v10 = vld [vmem:[#allocation11 + $0x20] sm:$0xff]  }
  0x60   :  { %1054 = vmatpush3.bf16.msra.mxu0 %v1219_v21  ;;  %v1253_v6 = vld [vmem:[#allocation10 + $0x38] sm:$0xff]   ;;  %v1257_v11 = vld [vmem:[#allocation10 + $0x28] sm:$0xff]   ;;  %v1259_v13 = vld [vmem:[#allocation10 + $0x20] sm:$0xff]  }
  0x61   :  { %1055 = vmatprep.subr.bf16.mxu0 %v1222_v24  ;;  %v1258_v12 = vld [vmem:[#allocation11 + $0x18] sm:$0xff]   ;;  %v1260_v14 = vld [vmem:[#allocation11 + $0x10] sm:$0xff]   ;;  %v1262_v16 = vld [vmem:[#allocation11 + $0x8] sm:$0xff]  }
  0x62   :  { %1076 = vmatpush3.bf16.msra.mxu1 %v1221_v23  ;;  %v1261_v15 = vld [vmem:[#allocation10 + $0x18] sm:$0xff]   ;;  %v1263_v17 = vld [vmem:[#allocation10 + $0x10] sm:$0xff]   ;;  %v1264_v18 = vld [vmem:[#allocation11] sm:$0xff]  }
  0x63   :  { %1077 = vmatprep.subr.bf16.mxu1 %v1224_v26  ;;  %v1265_v19 = vld [vmem:[#allocation10 + $0x8] sm:$0xff]   ;;  %v1266_v20 = vld [vmem:[#allocation10] sm:$0xff]  }
  0x64   :  { %1056 = vmatpush3.bf16.msra.mxu0 %v1223_v25  ;;  %v970_v32 = vld [vmem:[%s1554_s3] ss:$0 sm:$0xff] }
  0x65   :  { %1057 = vmatprep.subr.bf16.mxu0 %v1226_v28 }
  0x66   :  { %1078 = vmatpush3.bf16.msra.mxu1 %v1225_v27 }
  0x67   :  { %1079 = vmatprep.subr.bf16.mxu1 %v1228_v30 }
  0x68   :  { %1058 = vmatpush3.bf16.msra.mxu0 %v1227_v29  ;;  %v1019_v29 = vld [vmem:[%s1556_s5] ss:$0 sm:$0xff] }
  0x69   :  { %1087 = vmatprep.subr.bf16.mxu0 %v1230_v36 }
  0x6a   :  { %1080 = vmatpush3.bf16.msra.mxu1 %v1229_v33 }
  0x6b   :  { %550 = vmatmul.mubr.bf16.vlgmr.msra.gmra.mxu0 %v118_v35  ;;  %1133 = vmatprep.subr.bf16.mxu1 %v1429_v44 }
  0x6c   :  { %1088 = vmatpush3.bf16.msra.mxu0 %v1231_v39  ;;  %629 = vmatprep.mubr.bf16.mxu0 %v123_v0 }
  0x6d   :  { %590 = vmatmul.mubr.bf16.vlgmr.msra.gmra.mxu1 %v120_v41  ;;  %1089 = vmatprep.subr.bf16.mxu0 %v1232_v42 }
  0x6e   :  { %1143 = vmatprep.mubr.msk.bf16.mxu1 %vm1430_vm1, %v1429_v44  ;;  %1134 = vmatpush3.bf16.msra.mxu1 %v690_v49 }
  0x6f   :  { %1135 = vmatprep.subr.bf16.mxu1 %v1429_v44 }
  0x70   :  { %1090 = vmatpush3.bf16.msra.mxu0 %v1233_v43 }
  0x71   :  { %1091 = vmatprep.subr.bf16.mxu0 %v1234_v45 }
  0x72   :  { %1136 = vmatpush3.bf16.msra.mxu1 %v1239_v50 }
  0x73   :  { %1137 = vmatprep.subr.bf16.mxu1 %v1429_v44 }
  0x74   :  { %1092 = vmatpush3.bf16.msra.mxu0 %v1235_v46 }
  0x75   :  { %1093 = vmatprep.subr.bf16.mxu0 %v1237_v48 }
  0x76   :  { %1138 = vmatpush3.bf16.msra.mxu1 %v1242_v53 }
  0x77   :  { %1139 = vmatprep.subr.bf16.mxu1 %v1429_v44 }
  0x78   :  { %1094 = vmatpush3.bf16.msra.mxu0 %v1238_v51 }
  0x79   :  { %1095 = vmatprep.subr.bf16.mxu0 %v1240_v52 }
  0x7a   :  { %1140 = vmatpush3.bf16.msra.mxu1 %v1245_v56 }
  0x7b   :  { %1141 = vmatprep.subr.bf16.mxu1 %v1429_v44 }
  0x7c   :  { %1096 = vmatpush3.bf16.msra.mxu0 %v1241_v54 }
  0x7d   :  { %1097 = vmatprep.subr.bf16.mxu0 %v1243_v55  ;;  %v1042_v55 = vld [vmem:[%s1559_s8] ss:$0 sm:$0xff] }
  0x7e   :  { %1142 = vmatpush3.bf16.msra.mxu1 %v1248_v60 }
  0x7f   :  { %1147 = vmatprep.subr.bf16.mxu1 %v1429_v44 }
  0x80   :  { %1098 = vmatpush3.bf16.msra.mxu0 %v1244_v57 }
  0x81   :  { %1099 = vmatprep.subr.bf16.mxu0 %v1246_v58  ;;  %1144 = vmatmul.mubr.msk.bf16.vlgmr.msra.gmra.mxu1 %vm684_vm2, %v125_v2 }
  0x82   :  { %1163 = vmatprep.mubr.msk.bf16.mxu1 %vm1430_vm1, %v1429_v44  ;;  %1148 = vmatpush3.bf16.msra.mxu1 %v1251_v5 }
  0x83   :  { %1149 = vmatprep.subr.bf16.mxu1 %v1429_v44 }
  0x84   :  { %1100 = vmatpush3.bf16.msra.mxu0 %v1247_v59 }
  0x85   :  { %1101 = vmatprep.subr.bf16.mxu0 %v1249_v62 }
  0x86   :  { %1150 = vmatpush3.bf16.msra.mxu1 %v1252_v7 }
  0x87   :  { %1151 = vmatprep.subr.bf16.mxu1 %v1429_v44 }
  0x88   :  { %1102 = vmatpush3.bf16.msra.mxu0 %v1250_v1 }
  0x89   :  { %1167 = vmatprep.subr.bf16.mxu0 %v1429_v44 }
  0x8a   :  { %1152 = vmatpush3.bf16.msra.mxu1 %v1254_v9 }
  0x8b   :  { %630 = vmatmul.mubr.bf16.vlgmr.msra.gmra.mxu0 %v122_v4  ;;  %1153 = vmatprep.subr.bf16.mxu1 %v1429_v44 }
  0x8c   :  { %1183 = vmatprep.mubr.msk.bf16.mxu0 %vm1430_vm1, %v1429_v44  ;;  %1168 = vmatpush3.bf16.msra.mxu0 %v1253_v6 }
  0x8d   :  { %1169 = vmatprep.subr.bf16.mxu0 %v1429_v44 }
  0x8e   :  { %1154 = vmatpush3.bf16.msra.mxu1 %v1256_v10 }
  0x8f   :  { %1155 = vmatprep.subr.bf16.mxu1 %v1429_v44 }
  0x90   :  { %1170 = vmatpush3.bf16.msra.mxu0 %v1255_v8 }
  0x91   :  { %1171 = vmatprep.subr.bf16.mxu0 %v1429_v44 }
  0x92   :  { %1156 = vmatpush3.bf16.msra.mxu1 %v1258_v12 }
  0x93   :  { %1157 = vmatprep.subr.bf16.mxu1 %v1429_v44 }
  0x94   :  { %1172 = vmatpush3.bf16.msra.mxu0 %v1257_v11 }
  0x95   :  { %1173 = vmatprep.subr.bf16.mxu0 %v1429_v44 }
  0x96   :  { %1158 = vmatpush3.bf16.msra.mxu1 %v1260_v14 }
  0x97   :  { %1159 = vmatprep.subr.bf16.mxu1 %v1429_v44 }
  0x98   :  { %1174 = vmatpush3.bf16.msra.mxu0 %v1259_v13 }
  0x99   :  { %1175 = vmatprep.subr.bf16.mxu0 %v1429_v44 }
  0x9a   :  { %1160 = vmatpush3.bf16.msra.mxu1 %v1262_v16 }
  0x9b   :  { %1161 = vmatprep.subr.bf16.mxu1 %v1429_v44 }
  0x9c   :  { %1176 = vmatpush3.bf16.msra.mxu0 %v1261_v15 }
  0x9d   :  { %1177 = vmatprep.subr.bf16.mxu0 %v1429_v44 }
  0x9e   :  { %1162 = vmatpush3.bf16.msra.mxu1 %v1264_v18 }
  0xa0   :  { %1178 = vmatpush3.bf16.msra.mxu0 %v1263_v17 }
  0xa1   :  { %1179 = vmatprep.subr.bf16.mxu0 %v1429_v44 }
  0xa4   :  { %1180 = vmatpush3.bf16.msra.mxu0 %v1265_v19 }
  0xa5   :  { %1181 = vmatprep.subr.bf16.mxu0 %v1429_v44 }
  0xa8   :  { %1182 = vmatpush3.bf16.msra.mxu0 %v1266_v20 }
 0x12b   :  { %v1059_v21 = vpop.f32.mrf.mxu0 }
 0x12d   :  { %v1060_v22 = vpop.f32.mrf.mxu0  ;;  %v1081_v23 = vpop.f32.mrf.mxu1 }
 0x12e   :  { %v1061_v30 = vadd.f32 %v1060_v22, %v1059_v21 }
 0x12f   :  { %v1062_v24 = vpop.f32.mrf.mxu0  ;;  %v1082_v25 = vpop.f32.mrf.mxu1 }
 0x130   :  { %v552_v35 = vadd.f32 %v1061_v30, %v970_v32  ;;  %v1083_v36 = vadd.f32 %v1082_v25, %v1081_v23 }
 0x131   :  { %v1063_v26 = vpop.f32.mrf.mxu0  ;;  %v1084_v27 = vpop.f32.mrf.mxu1 }
 0x132   :  { %v592_v41 = vadd.f32 %v1083_v36, %v552_v35 }
 0x133   :  { %v1085_v28 = vpop.f32.mrf.mxu1 }
 0x141   :  { %v726_v31 = vpop.f32.mrf.mxu1 }
 0x142   :  { %v727_v33 = vadd.f32 %v1019_v29, %v726_v31 }
 0x143   :  { %v1145_v34 = vpop.f32.mrf.mxu1 }
 0x144   :  { %1267 = vtanh.f32 %v727_v33 }
 0x145   :  { %v729_v37 = vpop.f32.mrf.mxu1 }
 0x147   :  { %v1146_v39 = vpop.f32.mrf.mxu1 }
 0x14b   :  { %v1103_v38 = vpop.f32.mrf.mxu0 }
 0x14d   :  { %v1104_v40 = vpop.f32.mrf.mxu0 }
 0x14e   :  { %v1105_v42 = vadd.f32 %v1104_v40, %v1103_v38 }
 0x14f   :  { %v1106_v43 = vpop.f32.mrf.mxu0 }
 0x150   :  { %v632_v44 = vadd.f32 %v1105_v42, %v592_v41 }
 0x151   :  { %v1107_v45 = vpop.f32.mrf.mxu0  ;;  %v1268_v46 = vpop.eup %1267 }
 0x152   :  { %1269 = vtanh.f32 %v632_v44  ;;  %v750_v47 = vpack.c.bf16 %v1268_v46, %v1268_v46 }
 0x154   :  { %1164 = vmatmul.mubr.bf16.vlgmr.msra.gmra.mxu1 %v750_v47 }
 0x15f   :  { %v1270_v48 = vpop.eup %1269 }
 0x160   :  { %v733_v49 = vpack.c.bf16 %v1270_v48, %v1270_v48 }
 0x162   :  { %1184 = vmatmul.mubr.bf16.vlgmr.msra.gmra.mxu0 %v733_v49 }
 0x214   :  { %v849_v50 = vpop.f32.mrf.mxu1 }
 0x216   :  { %v1165_v51 = vpop.f32.mrf.mxu1 }
 0x218   :  { %v852_v52 = vpop.f32.mrf.mxu1 }
 0x21a   :  { %v1166_v53 = vpop.f32.mrf.mxu1 }
 0x222   :  { %v937_v54 = vpop.f32.mrf.mxu0 }
 0x223   :  { %v938_v56 = vadd.f32 %v937_v54, %v849_v50 }
 0x224   :  { %v1185_v57 = vpop.f32.mrf.mxu0 }
 0x225   :  { %v950_v58 = vadd.f32 %v1042_v55, %v938_v56 }
 0x226   :  { %v940_v59 = vpop.f32.mrf.mxu0 }
 0x227   :  { %951 = vst [vmem:[#allocation13] sm:$0xff] %v950_v58 }
 0x228   :  { %v1186_v60 = vpop.f32.mrf.mxu0 }
 0x229   :  { %1402 = shalt.err (!%p1399_p6)
}
 0x22a   :  { %961 = dma.vmem_to_hbm [thread:$0]  %s959_s19, 128, %s1560_s9, [#allocation4]  }
 0x22b   :  { %1419 = dma.done.wait [#allocation4], 128  }
 0x22c   :  { %1420 = vsyncadd [#allocation4], 4294967168 }
 0x22d   :  { %965 = vsyncpa [#allocation3], 1 }
 0x22e   :  { %966 = vsyncpa [#allocation6], 1 }
 0x22f   :  { %967 = vsyncpa [#allocation9], 1 }
 0x230   :  { %968 = vsyncpa [#allocation12], 1 }
 0x231   :  { %969 = vsyncpa [#allocation4], 1 }

</bundles_post_ra>
